<compile_context>
chip_gen: v5e
topology: v5e:2x2
jax: 0.10.0
libtpu: 0.0.40
codegen_flags: <defaults>
</compile_context>

<pallas_src>
import jax
import jax.numpy as jnp
from jax.experimental import pallas as pl
from jax.experimental.pallas import tpu as pltpu


def _soft_dot_attention_kernel(q_ref, kv_ref, bias_ref,
                               wq_ref, bq_ref, wkv_t_ref,
                               w1_ref, b1_ref, wout_q_ref,
                               h_ref, attn_ref):
    q = q_ref[...]                                   # (TB, Dq)     native dtype
    kv = kv_ref[...]                                 # (TB, Sp, Dkv) native dtype

    # linear_q(q): (TB, H), f32 accumulation on the MXU.
    x_q = (jnp.dot(q, wq_ref[...], preferred_element_type=jnp.float32)
           + bq_ref[...].astype(jnp.float32))

    # Pull the query through linear_kv instead of projecting every kv row:
    #   logits[b,s] = (kv[b,s,:] @ Wkv + bkv) . x_q[b,:]
    #               = kv[b,s,:] . (x_q[b,:] @ Wkv^T) + bkv . x_q[b,:]
    # The per-row constant bkv.x_q is dropped: softmax is shift-invariant and
    # only the probabilities are returned (output_prob=True).
    u = jnp.dot(x_q, wkv_t_ref[...], preferred_element_type=jnp.float32)   # (TB, Dkv)

    # Attention logits on the MXU (batched matmul, same pattern as flash attn).
    logits = jnp.einsum("bqd,bsd->bqs", u[:, None, :].astype(kv.dtype), kv,
                        preferred_element_type=jnp.float32)                # (TB, 1, Sp)
    # Additive mask bias: 0 for valid, -1e30 for user-masked / seq padding.
    logits = logits + bias_ref[...][:, None, :]

    # Softmax over the sequence dim (f32, max-subtracted).
    m = jnp.max(logits, axis=-1, keepdims=True)
    e = jnp.exp(logits - m)
    p = e / jnp.sum(e, axis=-1, keepdims=True)                             # (TB, 1, Sp)

    # Weighted values, folded through linear_out's value half:
    #   wsum = p @ (kv @ Wkv + bkv) = (p @ kv) @ Wkv + bkv       (sum_s p = 1)
    #   h~   = tanh(wsum @ Wout_v + q @ Wout_q)
    #        = tanh((p @ kv) @ (Wkv @ Wout_v) + bkv @ Wout_v + q @ Wout_q)
    ctx = jnp.einsum("bqs,bsd->bqd", p.astype(kv.dtype), kv,
                     preferred_element_type=jnp.float32)[:, 0, :]          # (TB, Dkv)
    h = jnp.tanh(
        jnp.dot(ctx.astype(w1_ref.dtype), w1_ref[...],
                preferred_element_type=jnp.float32)
        + b1_ref[...].astype(jnp.float32)
        + jnp.dot(q, wout_q_ref[...], preferred_element_type=jnp.float32))

    h_ref[...] = h.astype(h_ref.dtype)
    attn_ref[...] = p[:, 0, :].astype(attn_ref.dtype)


def soft_dot_attention(q, kv, wq, bq, wkv, bkv, wout_v, wout_q,
                       mask=None, block_b=None):
    """q: (B, Dq), kv: (B, S, Dkv), optional bool mask (B, S) (True = masked).

    Returns (h_tilde (B, H) in q.dtype, attn_prob (B, S) float32).
    """
    B, Dq = q.shape
    _, S, Dkv = kv.shape
    H = wq.shape[1]

    # ---- sequence padding to a multiple of 8 (clean sublane layout); padded
    # columns get an additive -1e30 bias so they receive ~0 probability.
    Sp = max(8, -(-S // 8) * 8)
    neg = jnp.float32(-1e30)
    bias = jnp.where(jnp.arange(Sp)[None, :] < S, jnp.float32(0.0), neg)
    bias = jnp.broadcast_to(bias, (B, Sp)).astype(jnp.float32)
    if mask is not None:
        m = mask.astype(bool)
        if Sp != S:
            m = jnp.pad(m, ((0, 0), (0, Sp - S)), constant_values=False)
        bias = jnp.where(m, neg, bias)
    if Sp != S:
        kv = jnp.pad(kv, ((0, 0), (0, Sp - S), (0, 0)))

    # ---- weight folding (tiny XLA matmuls, done once outside the kernel).
    wkv_t = wkv.T                               # (H, Dkv)  query -> kv space
    w1 = wkv @ wout_v                           # (Dkv, H)  context -> tilde
    b1 = (bkv @ wout_v).reshape(1, H)           # (1, H)
    bq2 = bq.reshape(1, H)

    # ---- batch tiling: largest multiple-of-8 block whose kv tile stays ~2 MiB
    # (double-buffered by the pipeline); axis marked "parallel" for megacore.
    if block_b is None:
        if B <= 8:
            block_b = B
        else:
            row_bytes = Sp * Dkv * kv.dtype.itemsize
            bb = max(8, min(256, (2 * 1024 * 1024 // max(row_bytes, 1)) // 8 * 8))
            block_b = int(min(bb, -(-B // 8) * 8))
    Bp = -(-B // block_b) * block_b
    if Bp != B:
        q = jnp.pad(q, ((0, Bp - B), (0, 0)))
        kv = jnp.pad(kv, ((0, Bp - B), (0, 0), (0, 0)))
        bias = jnp.pad(bias, ((0, Bp - B), (0, 0)))
    num_blocks = Bp // block_b

    def batch2d(d):
        return pl.BlockSpec((block_b, d), lambda i: (i, 0))

    def const_spec(shape):
        n = len(shape)
        return pl.BlockSpec(shape, lambda i, _n=n: (0,) * _n)

    grid_spec = pltpu.PrefetchScalarGridSpec(
        num_scalar_prefetch=0,
        grid=(num_blocks,),
        in_specs=[
            batch2d(Dq),                                            # q
            pl.BlockSpec((block_b, Sp, Dkv), lambda i: (i, 0, 0)),  # kv
            batch2d(Sp),                                            # mask bias
            const_spec(wq.shape),                                   # wq     (VMEM-resident)
            const_spec((1, H)),                                     # bq
            const_spec(wkv_t.shape),                                # wkv^T
            const_spec(w1.shape),                                   # wkv @ wout_v
            const_spec((1, H)),                                     # bkv @ wout_v
            const_spec(wout_q.shape),                               # wout_q
        ],
        out_specs=(
            pl.BlockSpec((block_b, H), lambda i: (i, 0)),           # h_tilde
            pl.BlockSpec((block_b, Sp), lambda i: (i, 0)),          # attn_prob
        ),
    )

    h, attn = pl.pallas_call(
        _soft_dot_attention_kernel,
        out_shape=(jax.ShapeDtypeStruct((Bp, H), q.dtype),
                   jax.ShapeDtypeStruct((Bp, Sp), jnp.float32)),
        grid_spec=grid_spec,
        compiler_params=pltpu.CompilerParams(
            dimension_semantics=("parallel",),
            # Safe scoped-VMEM budget on v5e/v6e (128 MiB physical) and
            # v7x (64 MiB physical).
            vmem_limit_bytes=32 * 1024 * 1024,
        ),
    )(q, kv, bias, wq, bq2, wkv_t, w1, b1, wout_q)

    return h[:B], attn[:B, :S]


def _reference(q, kv, wq, bq, wkv, bkv, wout_v, wout_q, mask=None):
    x_q = q @ wq + bq
    x_kv = jnp.einsum("bsd,dh->bsh", kv, wkv) + bkv
    attn = jnp.einsum("bsh,bh->bs", x_kv, x_q)
    if mask is not None:
        attn = jnp.where(mask, -jnp.inf, attn)
    p = jax.nn.softmax(attn, axis=1)
    weighted = jnp.einsum("bs,bsh->bh", p, x_kv)
    h = jnp.tanh(weighted @ wout_v + q @ wout_q)
    return h, p


if __name__ == "__main__":
    # Small shapes; S=12 exercises the sequence padding path, and the masked
    # call below uses block_b=8 to exercise a 2-step pipelined grid.
    B, S, Dq, Dkv, H = 16, 12, 32, 16, 32
    key = jax.random.PRNGKey(0)
    kq, kkv, k1, k2, k3, k4, k5, k6, k7 = jax.random.split(key, 9)

    q = jax.random.normal(kq, (B, Dq), dtype=jnp.float32)
    kv = jax.random.normal(kkv, (B, S, Dkv), dtype=jnp.float32)

    # nn.Linear parameters, stored pre-transposed as (in, out).
    wq = jax.random.normal(k1, (Dq, H), dtype=jnp.float32) * 0.1
    bq = jax.random.normal(k2, (H,), dtype=jnp.float32) * 0.1
    wkv = jax.random.normal(k3, (Dkv, H), dtype=jnp.float32) * 0.1
    bkv = jax.random.normal(k4, (H,), dtype=jnp.float32) * 0.1
    # linear_out weight (H, Dq+H) split into value part and query part (transposed).
    wout_v = jax.random.normal(k5, (H, H), dtype=jnp.float32) * 0.1
    wout_q = jax.random.normal(k6, (Dq, H), dtype=jnp.float32) * 0.1

    # mask=None path (default block_b -> single grid step).
    h_tilde, attn_prob = soft_dot_attention(q, kv, wq, bq, wkv, bkv, wout_v, wout_q)
    jax.block_until_ready((h_tilde, attn_prob))
    h_ref, p_ref = _reference(q, kv, wq, bq, wkv, bkv, wout_v, wout_q)
    assert jnp.allclose(h_tilde, h_ref, atol=3e-5, rtol=3e-5)
    assert jnp.allclose(attn_prob, p_ref, atol=3e-5, rtol=3e-5)

    # masked path (masked_fill_(mask, -inf) before the softmax), 2-step grid.
    mask = jax.random.bernoulli(k7, 0.3, (B, S))
    mask = mask.at[:, 0].set(False)          # keep >=1 valid position per row
    h_m, p_m = soft_dot_attention(q, kv, wq, bq, wkv, bkv, wout_v, wout_q,
                                  mask=mask, block_b=8)
    jax.block_until_ready((h_m, p_m))
    h_mr, p_mr = _reference(q, kv, wq, bq, wkv, bkv, wout_v, wout_q, mask=mask)
    assert jnp.allclose(h_m, h_mr, atol=3e-5, rtol=3e-5)
    assert jnp.allclose(p_m, p_mr, atol=3e-5, rtol=3e-5)

    print("KERNEL_OK")
</pallas_src>

<mosaic_0001>
module attributes {stable_mosaic.version = 11 : i64} {
  func.func @_soft_dot_attention_kernel(%arg0: i32, %arg1: memref<16x32xf32, #tpu.memory_space<vmem>>, %arg2: memref<16x16x16xf32, #tpu.memory_space<vmem>>, %arg3: memref<16x16xf32, #tpu.memory_space<vmem>>, %arg4: memref<32x32xf32, #tpu.memory_space<vmem>>, %arg5: memref<1x32xf32, #tpu.memory_space<vmem>>, %arg6: memref<32x16xf32, #tpu.memory_space<vmem>>, %arg7: memref<16x32xf32, #tpu.memory_space<vmem>>, %arg8: memref<1x32xf32, #tpu.memory_space<vmem>>, %arg9: memref<32x32xf32, #tpu.memory_space<vmem>>, %arg10: memref<16x32xf32, #tpu.memory_space<vmem>>, %arg11: memref<16x16xf32, #tpu.memory_space<vmem>>) attributes {dimension_semantics = [#tpu.dimension_semantics<parallel>], iteration_bounds = array<i64: 1>, scalar_prefetch = 0 : i64, scratch_operands = 0 : i64, tpu.core_type = #tpu.core_type<tc>, window_params = [{transform_indices = @transform_0, window_bounds = array<i64: 16, 32>}, {transform_indices = @transform_1, window_bounds = array<i64: 16, 16, 16>}, {transform_indices = @transform_2, window_bounds = array<i64: 16, 16>}, {pipeline_mode = #tpu.pipeline_mode<synchronous>, transform_indices = @transform_3, window_bounds = array<i64: 32, 32>}, {pipeline_mode = #tpu.pipeline_mode<synchronous>, transform_indices = @transform_4, window_bounds = array<i64: 1, 32>}, {pipeline_mode = #tpu.pipeline_mode<synchronous>, transform_indices = @transform_5, window_bounds = array<i64: 32, 16>}, {pipeline_mode = #tpu.pipeline_mode<synchronous>, transform_indices = @transform_6, window_bounds = array<i64: 16, 32>}, {pipeline_mode = #tpu.pipeline_mode<synchronous>, transform_indices = @transform_7, window_bounds = array<i64: 1, 32>}, {pipeline_mode = #tpu.pipeline_mode<synchronous>, transform_indices = @transform_8, window_bounds = array<i64: 32, 32>}, {transform_indices = @transform_9, window_bounds = array<i64: 16, 32>}, {transform_indices = @transform_10, window_bounds = array<i64: 16, 16>}]} {
    %c0 = arith.constant 0 : index
    %c0_0 = arith.constant 0 : index
    %0 = vector.load %arg1[%c0, %c0_0] : memref<16x32xf32, #tpu.memory_space<vmem>>, vector<16x32xf32>
    %c0_1 = arith.constant 0 : index
    %c0_2 = arith.constant 0 : index
    %c0_3 = arith.constant 0 : index
    %1 = vector.load %arg2[%c0_1, %c0_2, %c0_3] : memref<16x16x16xf32, #tpu.memory_space<vmem>>, vector<16x16x16xf32>
    %c0_4 = arith.constant 0 : index
    %c0_5 = arith.constant 0 : index
    %2 = vector.load %arg4[%c0_4, %c0_5] : memref<32x32xf32, #tpu.memory_space<vmem>>, vector<32x32xf32>
    %cst = arith.constant dense<0.000000e+00> : vector<16x32xf32>
    %3 = tpu.matmul %0, %2, %cst {dimension_numbers = #tpu.dot_dimension_numbers<[1], [0], [0], [1], [0, 0, 1, 1], [], []>} : vector<16x32xf32>, vector<32x32xf32>, vector<16x32xf32> -> vector<16x32xf32>
    %c0_6 = arith.constant 0 : index
    %c0_7 = arith.constant 0 : index
    %4 = vector.load %arg5[%c0_6, %c0_7] : memref<1x32xf32, #tpu.memory_space<vmem>>, vector<1x32xf32>
    %5 = vector.broadcast %4 : vector<1x32xf32> to vector<16x32xf32>
    %6 = arith.addf %3, %5 : vector<16x32xf32>
    %c0_8 = arith.constant 0 : index
    %c0_9 = arith.constant 0 : index
    %7 = vector.load %arg6[%c0_8, %c0_9] : memref<32x16xf32, #tpu.memory_space<vmem>>, vector<32x16xf32>
    %cst_10 = arith.constant dense<0.000000e+00> : vector<16x16xf32>
    %8 = tpu.matmul %6, %7, %cst_10 {dimension_numbers = #tpu.dot_dimension_numbers<[1], [0], [0], [1], [0, 0, 1, 1], [], []>} : vector<16x32xf32>, vector<32x16xf32>, vector<16x16xf32> -> vector<16x16xf32>
    %9 = vector.shape_cast %8 : vector<16x16xf32> to vector<16x1x16xf32>
    "tpu.trace_start"() <{level = 10 : i32, message = "bqd,bsd->bqs"}> : () -> ()
    %cst_11 = arith.constant dense<0.000000e+00> : vector<16x1x16xf32>
    %10 = tpu.matmul %9, %1, %cst_11 {dimension_numbers = #tpu.dot_dimension_numbers<[2], [2], [1], [1], [0, 0, 0, 1, 1, 1], [0], [0]>} : vector<16x1x16xf32>, vector<16x16x16xf32>, vector<16x1x16xf32> -> vector<16x1x16xf32>
    "tpu.trace_stop"() : () -> ()
    %c0_12 = arith.constant 0 : index
    %c0_13 = arith.constant 0 : index
    %11 = vector.load %arg3[%c0_12, %c0_13] : memref<16x16xf32, #tpu.memory_space<vmem>>, vector<16x16xf32>
    %12 = vector.shape_cast %11 : vector<16x16xf32> to vector<16x1x16xf32>
    %13 = arith.addf %10, %12 : vector<16x1x16xf32>
    %cst_14 = arith.constant dense<0xFF800000> : vector<16x1xf32>
    %14 = vector.multi_reduction <maximumf>, %13, %cst_14 [2] : vector<16x1x16xf32> to vector<16x1xf32>
    %15 = vector.shape_cast %14 : vector<16x1xf32> to vector<16x1x1xf32>
    %16 = vector.broadcast %15 : vector<16x1x1xf32> to vector<16x1x16xf32>
    %17 = arith.subf %13, %16 : vector<16x1x16xf32>
    %18 = math.exp %17 : vector<16x1x16xf32>
    %cst_15 = arith.constant dense<0.000000e+00> : vector<16x1xf32>
    %19 = vector.multi_reduction <add>, %18, %cst_15 [2] : vector<16x1x16xf32> to vector<16x1xf32>
    %20 = vector.shape_cast %19 : vector<16x1xf32> to vector<16x1x1xf32>
    %21 = vector.broadcast %20 : vector<16x1x1xf32> to vector<16x1x16xf32>
    %22 = arith.divf %18, %21 : vector<16x1x16xf32>
    "tpu.trace_start"() <{level = 10 : i32, message = "bqs,bsd->bqd"}> : () -> ()
    %cst_16 = arith.constant dense<0.000000e+00> : vector<16x1x16xf32>
    %23 = tpu.matmul %22, %1, %cst_16 {dimension_numbers = #tpu.dot_dimension_numbers<[2], [1], [1], [2], [0, 0, 0, 1, 1, 2], [0], [0]>} : vector<16x1x16xf32>, vector<16x16x16xf32>, vector<16x1x16xf32> -> vector<16x1x16xf32>
    "tpu.trace_stop"() : () -> ()
    %24 = vector.shape_cast %23 : vector<16x1x16xf32> to vector<16x16xf32>
    %c0_17 = arith.constant 0 : index
    %c0_18 = arith.constant 0 : index
    %25 = vector.load %arg7[%c0_17, %c0_18] : memref<16x32xf32, #tpu.memory_space<vmem>>, vector<16x32xf32>
    %cst_19 = arith.constant dense<0.000000e+00> : vector<16x32xf32>
    %26 = tpu.matmul %24, %25, %cst_19 {dimension_numbers = #tpu.dot_dimension_numbers<[1], [0], [0], [1], [0, 0, 1, 1], [], []>} : vector<16x16xf32>, vector<16x32xf32>, vector<16x32xf32> -> vector<16x32xf32>
    %c0_20 = arith.constant 0 : index
    %c0_21 = arith.constant 0 : index
    %27 = vector.load %arg8[%c0_20, %c0_21] : memref<1x32xf32, #tpu.memory_space<vmem>>, vector<1x32xf32>
    %28 = vector.broadcast %27 : vector<1x32xf32> to vector<16x32xf32>
    %29 = arith.addf %26, %28 : vector<16x32xf32>
    %c0_22 = arith.constant 0 : index
    %c0_23 = arith.constant 0 : index
    %30 = vector.load %arg9[%c0_22, %c0_23] : memref<32x32xf32, #tpu.memory_space<vmem>>, vector<32x32xf32>
    %cst_24 = arith.constant dense<0.000000e+00> : vector<16x32xf32>
    %31 = tpu.matmul %0, %30, %cst_24 {dimension_numbers = #tpu.dot_dimension_numbers<[1], [0], [0], [1], [0, 0, 1, 1], [], []>} : vector<16x32xf32>, vector<32x32xf32>, vector<16x32xf32> -> vector<16x32xf32>
    %32 = arith.addf %29, %31 : vector<16x32xf32>
    %33 = math.tanh %32 : vector<16x32xf32>
    %c0_25 = arith.constant 0 : index
    %c0_26 = arith.constant 0 : index
    %34 = vector.load %arg10[%c0_25, %c0_26] : memref<16x32xf32, #tpu.memory_space<vmem>>, vector<16x32xf32>
    tpu.vector_store %arg10[%c0_25, %c0_26], %33 {strides = array<i32>} : memref<16x32xf32, #tpu.memory_space<vmem>>, vector<16x32xf32>,
    %35 = vector.shape_cast %22 : vector<16x1x16xf32> to vector<16x16xf32>
    %c0_27 = arith.constant 0 : index
    %c0_28 = arith.constant 0 : index
    %36 = vector.load %arg11[%c0_27, %c0_28] : memref<16x16xf32, #tpu.memory_space<vmem>>, vector<16x16xf32>
    tpu.vector_store %arg11[%c0_27, %c0_28], %35 {strides = array<i32>} : memref<16x16xf32, #tpu.memory_space<vmem>>, vector<16x16xf32>,
    return
  }
  func.func @transform_0(%arg0: i32) -> (i32, i32) {
    %c0_i32 = arith.constant 0 : i32
    %c0_i32_0 = arith.constant 0 : i32
    return %arg0, %c0_i32 : i32, i32
  }
  func.func @transform_1(%arg0: i32) -> (i32, i32, i32) {
    %c0_i32 = arith.constant 0 : i32
    %c0_i32_0 = arith.constant 0 : i32
    %c0_i32_1 = arith.constant 0 : i32
    return %arg0, %c0_i32, %c0_i32_0 : i32, i32, i32
  }
  func.func @transform_2(%arg0: i32) -> (i32, i32) {
    %c0_i32 = arith.constant 0 : i32
    %c0_i32_0 = arith.constant 0 : i32
    return %arg0, %c0_i32 : i32, i32
  }
  func.func @transform_3(%arg0: i32) -> (i32, i32) {
    %c0_i32 = arith.constant 0 : i32
    %c0_i32_0 = arith.constant 0 : i32
    %c0_i32_1 = arith.constant 0 : i32
    return %c0_i32, %c0_i32_0 : i32, i32
  }
  func.func @transform_4(%arg0: i32) -> (i32, i32) {
    %c0_i32 = arith.constant 0 : i32
    %c0_i32_0 = arith.constant 0 : i32
    %c0_i32_1 = arith.constant 0 : i32
    return %c0_i32, %c0_i32_0 : i32, i32
  }
  func.func @transform_5(%arg0: i32) -> (i32, i32) {
    %c0_i32 = arith.constant 0 : i32
    %c0_i32_0 = arith.constant 0 : i32
    %c0_i32_1 = arith.constant 0 : i32
    return %c0_i32, %c0_i32_0 : i32, i32
  }
  func.func @transform_6(%arg0: i32) -> (i32, i32) {
    %c0_i32 = arith.constant 0 : i32
    %c0_i32_0 = arith.constant 0 : i32
    %c0_i32_1 = arith.constant 0 : i32
    return %c0_i32, %c0_i32_0 : i32, i32
  }
  func.func @transform_7(%arg0: i32) -> (i32, i32) {
    %c0_i32 = arith.constant 0 : i32
    %c0_i32_0 = arith.constant 0 : i32
    %c0_i32_1 = arith.constant 0 : i32
    return %c0_i32, %c0_i32_0 : i32, i32
  }
  func.func @transform_8(%arg0: i32) -> (i32, i32) {
    %c0_i32 = arith.constant 0 : i32
    %c0_i32_0 = arith.constant 0 : i32
    %c0_i32_1 = arith.constant 0 : i32
    return %c0_i32, %c0_i32_0 : i32, i32
  }
  func.func @transform_9(%arg0: i32) -> (i32, i32) {
    %c0_i32 = arith.constant 0 : i32
    %c0_i32_0 = arith.constant 0 : i32
    return %arg0, %c0_i32 : i32, i32
  }
  func.func @transform_10(%arg0: i32) -> (i32, i32) {
    %c0_i32 = arith.constant 0 : i32
    %c0_i32_0 = arith.constant 0 : i32
    return %arg0, %c0_i32 : i32, i32
  }
}

</mosaic_0001>

<bundles_post_ra>
// kernel: tpu_custom_call.1
= control target key start
LH: loop header
LB: loop body
LE: loop exit
PB: predicated region body
PF: predicated region fallthrough
CT: control target
= control target key end

     0   :  { %16 = vsyncpa [#allocation3], 0  ;;  %s2910_s0 = inlined_call_operand.vmem [shape: f32[16,32], index: 0, kind: input, shape index: {}]   ;;  %s2911_s1 = inlined_call_operand.hbm [shape: f32[16,16,16], index: 1, kind: input, shape index: {}]   ;;  %s2912_s2 = inlined_call_operand.hbm [shape: f32[16,16], index: 2, kind: input, shape index: {}]   ;;  %s2913_s3 = inlined_call_operand.vmem [shape: f32[32,32], index: 3, kind: input, shape index: {}]   ;;  %s2914_s4 = inlined_call_operand.vmem [shape: f32[1,32], index: 4, kind: input, shape index: {}]   ;;  %s2915_s5 = inlined_call_operand.vmem [shape: f32[32,16], index: 5, kind: input, shape index: {}]   ;;  %s2916_s6 = inlined_call_operand.hbm [shape: f32[16,32], index: 6, kind: input, shape index: {}]   ;;  %s2917_s7 = inlined_call_operand.vmem [shape: f32[1,32], index: 7, kind: input, shape index: {}]   ;;  %s2918_s8 = inlined_call_operand.hbm [shape: f32[32,32], index: 8, kind: input, shape index: {}]   ;;  %s2919_s9 = inlined_call_operand.hbm [shape: f32[16,32], index: 9, kind: output, shape index: {0}]   ;;  %s2920_s10 = inlined_call_operand.hbm [shape: f32[16,16], index: 10, kind: output, shape index: {1}]  }
   0x1   :  { %17 = vsyncpa [#allocation6], 0 }
   0x2   :  { %18 = vsyncpa [#allocation9], 0 }
   0x3   :  { %19 = vsyncpa [#allocation4], 0 }
   0x4   :  { %20 = vsyncpa [#allocation12], 0  ;;  %s40_s15 = sshll.u32 %s2912_s2, 4  ;;  %s1958_s16 = smov [#allocation5]   ;;  %s41_s15 = int_to_ptr.hbm [resolvable:$true] %s40_s15 }
   0x5   :  { %s42_s17 = sshll.u32 %s1958_s16, 4  ;;  %s27_s20 = sshll.u32 %s2911_s1, 4  ;;  %s43_s17 = int_to_ptr.vmem [resolvable:$true] %s42_s17  ;;  %s28_s20 = int_to_ptr.hbm [resolvable:$true] %s27_s20 }
   0x6   :  { %s1959_s21 = smov 128   ;;  %s1960_s22 = smov 8  }
   0x7   :  { %48 = dma.hbm_to_vmem [thread:$0]  %s41_s15, 256, %s43_s17, [#allocation6], %s1959_s21, %s1959_s21, %s1960_s22  }
   0x8   :  { %s1961_s23 = smov [#allocation2]   ;;  %s59_s2 = sshll.u32 %s2916_s6, 4  ;;  %s60_s2 = int_to_ptr.hbm [resolvable:$true] %s59_s2 }
   0x9   :  { %s29_s24 = sshll.u32 %s1961_s23, 4  ;;  %s74_s28 = sshll.u32 %s2918_s8, 4  ;;  %s30_s24 = int_to_ptr.vmem [resolvable:$true] %s29_s24  ;;  %s75_s28 = int_to_ptr.hbm [resolvable:$true] %s74_s28 }
   0xa   :  { %35 = dma.hbm_to_vmem [thread:$0]  %s28_s20, 4096, %s30_s24, [#allocation3], %s1959_s21, %s1959_s21, %s1960_s22  }
   0xb   :  { %s1962_s29 = smov [#allocation7]   ;;  %s1963_s11 = smov [#allocation8]  }
   0xc   :  { %s61_s30 = sshll.u32 %s1962_s29, 4  ;;  %s76_s6 = sshll.u32 %s1963_s11, 4  ;;  %s62_s30 = int_to_ptr.vmem [resolvable:$true] %s61_s30  ;;  %s77_s6 = int_to_ptr.vmem [resolvable:$true] %s76_s6 }
   0xd   :  { %67 = dma.hbm_to_vmem [thread:$0]  %s60_s2, 256, %s62_s30, [#allocation6], %s1959_s21, %s1959_s21, %s1960_s22  }
   0xe   :  { %82 = dma.hbm_to_vmem [thread:$0]  %s75_s28, 512, %s77_s6, [#allocation9], %s1959_s21, %s1959_s21, %s1960_s22  }
   0xf   :  { %1948 = dma.done.wait [#allocation3], 4096  }
  0x10   :  { %1949 = vsyncadd [#allocation3], 4294963200 }
  0x11   :  { %1950 = dma.done.wait [#allocation6], 512  }
  0x12   :  { %1951 = vsyncadd [#allocation6], 4294966784 }
  0x13   :  { %1952 = dma.done.wait [#allocation9], 512  }
  0x14   :  { %1953 = vsyncadd [#allocation9], 4294966784  ;;  %v136_v0 = vld [vmem:[%s2913_s3 + $0x18] sm:$0xff]  ;;  %v135_v1 = vld [vmem:[%s2913_s3 + $0x10] sm:$0xff]  ;;  %vm141_vm0 = vcmask 261120   ;;  %vm252_vm1 = vcmask 130048  }
  0x15   :  { %160 = vmatpush.msra.mxu0 %v136_v0  ;;  %1714 = vmatpush.msra.mxu2 %v136_v0  ;;  %v134_v2 = vld [vmem:[%s2913_s3 + $0x8] sm:$0xff]  ;;  %v174_v3 = vld [vmem:[%s2915_s5 + $0x18] sm:$0xff]  ;;  %v173_v4 = vld [vmem:[%s2915_s5 + $0x10] sm:$0xff]  ;;  %vm701_vm2 = vcmask 122880   ;;  %s1622_s15 = sshll.u32 %s2920_s10, 4  ;;  %s1965_s10 = smov [#allocation10]   ;;  %s1623_s15 = int_to_ptr.hbm [resolvable:$true] %s1622_s15 }
  0x16   :  { %v133_v5 = vld [vmem:[%s2913_s3] sm:$0xff]  ;;  %193 = vmatpush.msra.mxu1 %v174_v3  ;;  %1718 = vmatpush.msra.mxu3 %v174_v3  ;;  %v100_v7 = vld [vmem:[%s2910_s0 + $0x8] sm:$0xff]  ;;  %v2079_v11 = vld [vmem:[#allocation2 + $0x18] sm:$0xff]  ;;  %s1607_s18 = sshll.u32 %s1965_s10, 4  ;;  %s1609_s23 = sshll.u32 %s2919_s9, 4  ;;  %s1608_s18 = int_to_ptr.vmem [resolvable:$true] %s1607_s18  ;;  %s1610_s23 = int_to_ptr.hbm [resolvable:$true] %s1609_s23 }
  0x17   :  { %161 = vmatpush.msra.mxu0 %v135_v1  ;;  %1715 = vmatpush.msra.mxu2 %v135_v1  ;;  %v99_v6 = vld [vmem:[%s2910_s0] sm:$0xff]  ;;  %v172_v8 = vld [vmem:[%s2915_s5 + $0x8] sm:$0xff]  ;;  %v2087_v13 = vld [vmem:[#allocation2 + $0x58] sm:$0xff] }
  0x18   :  { %194 = vmatpush.msra.mxu1 %v173_v4  ;;  %1719 = vmatpush.msra.mxu3 %v173_v4  ;;  %v171_v9 = vld [vmem:[%s2915_s5] sm:$0xff]  ;;  %v2077_v10 = vld [vmem:[#allocation2 + $0x8] sm:$0xff]  ;;  %v2102_v20 = vld [vmem:[#allocation2 + $0x10] sm:$0xff] }
  0x19   :  { %162 = vmatpush.msra.mxu0 %v134_v2  ;;  %1716 = vmatpush.msra.mxu2 %v134_v2  ;;  %v2081_v12 = vld [vmem:[#allocation2 + $0x48] sm:$0xff]  ;;  %v2093_v14 = vld [vmem:[#allocation2] sm:$0xff]  ;;  %v2106_v22 = vld [vmem:[#allocation2 + $0x50] sm:$0xff] }
  0x1a   :  { %195 = vmatpush.msra.mxu1 %v172_v8  ;;  %1720 = vmatpush.msra.mxu3 %v172_v8  ;;  %v1730_v15 = vld [vmem:[%s2914_s4] ss:$0 sm:$0xff]  ;;  %v2114_v23 = vld [vmem:[#allocation2 + $0x28] sm:$0xff]  ;;  %v2118_v24 = vld [vmem:[#allocation2 + $0x38] sm:$0xff] }
  0x1b   :  { %163 = vmatpush.msra.mxu0 %v133_v5  ;;  %1717 = vmatpush.msra.mxu2 %v133_v5  ;;  %v2104_v21 = vld [vmem:[#allocation2 + $0x40] sm:$0xff]  ;;  %v2126_v26 = vld [vmem:[#allocation2 + $0x30] sm:$0xff]  ;;  %v2130_v27 = vld [vmem:[#allocation2 + $0x88] sm:$0xff] }
  0x1c   :  { %1642 = vmatmul.msk.f32.vlgmr.msra.gmra.mxu0 %vm141_vm0, %v99_v6  ;;  %1643 = vmatmul.msk.f32.vlgmr.msra.gmra.mxu2 %vm141_vm0, %v100_v7  ;;  %v2120_v25 = vld [vmem:[#allocation2 + $0x20] sm:$0xff]  ;;  %v2132_v28 = vld [vmem:[#allocation2 + $0x98] sm:$0xff]  ;;  %v2140_v30 = vld [vmem:[#allocation2 + $0x90] sm:$0xff] }
  0x1d   :  { %196 = vmatpush.msra.mxu1 %v171_v9  ;;  %1721 = vmatpush.msra.mxu3 %v171_v9  ;;  %v2138_v29 = vld [vmem:[#allocation2 + $0x80] sm:$0xff]  ;;  %v2146_v31 = vld [vmem:[#allocation2 + $0x68] sm:$0xff]  ;;  %v2149_v36 = vld [vmem:[#allocation2 + $0x78] sm:$0xff] }
  0x1e   :  { %1646 = vmatpush.xpose.msk.msrb.mxu2 %vm252_vm1, %v2077_v10  ;;  %1658 = vmatpush.xpose.msk.msrb.mxu0 %vm252_vm1, %v2081_v12  ;;  %v2153_v37 = vld [vmem:[#allocation2 + $0xc8] sm:$0xff]  ;;  %v128_v38 = vld [vmem:[#allocation2 + $0xd8] sm:$0xff]  ;;  %v2157_v39 = vld [vmem:[#allocation2 + $0x60] sm:$0xff] }
  0x1f   :  { %1649 = vmatpush.xpose.msk.msrb.mxu3 %vm252_vm1, %v2079_v11  ;;  %1661 = vmatpush.xpose.msk.msrb.mxu1 %vm252_vm1, %v2087_v13  ;;  %v2162_v40 = vld [vmem:[#allocation2 + $0x70] sm:$0xff]  ;;  %v2169_v41 = vld [vmem:[#allocation2 + $0xc0] sm:$0xff]  ;;  %v2171_v43 = vld [vmem:[#allocation2 + $0xa8] sm:$0xff] }
  0x20   :  { %v127_v44 = vld [vmem:[#allocation2 + $0xd0] sm:$0xff]  ;;  %v2176_v46 = vld [vmem:[#allocation2 + $0xb8] sm:$0xff]  ;;  %v2184_v47 = vld [vmem:[#allocation2 + $0xa0] sm:$0xff] }
  0x21   :  { %v2188_v49 = vld [vmem:[#allocation2 + $0xb0] sm:$0xff]  ;;  %v2195_v52 = vld [vmem:[#allocation2 + $0xe8] sm:$0xff]  ;;  %v2201_v54 = vld [vmem:[#allocation2 + $0xf8] sm:$0xff] }
  0x22   :  { %1647 = vmatpush.xpose.msk.msrb.mxu2 %vm252_vm1, %v2093_v14  ;;  %1659 = vmatpush.xpose.msk.msrb.mxu0 %vm252_vm1, %v2104_v21  ;;  %v2207_v56 = vld [vmem:[#allocation2 + $0xe0] sm:$0xff]  ;;  %v2212_v59 = vld [vmem:[#allocation2 + $0xf0] sm:$0xff] }
  0x23   :  { %1650 = vmatpush.xpose.msk.msrb.mxu3 %vm252_vm1, %v2102_v20  ;;  %1662 = vmatpush.xpose.msk.msrb.mxu1 %vm252_vm1, %v2106_v22  ;;  %v220_v63 = vld [vmem:[#allocation5] sm:$0xff] }
  0x24   :  { %v224_v3 = vrot.slane %v220_v63, 1  ;;  %v225_v5 = vrot.slane %v220_v63, 2 }
  0x26   :  { %1652 = vmatpush.xpose.msk.msra.mxu2 %vm252_vm1, %v2114_v23  ;;  %1670 = vmatpush.xpose.msk.msra.mxu0 %vm252_vm1, %v2130_v27 }
  0x2a   :  { %1653 = vmatpush.xpose.msk.msra.mxu2 %vm252_vm1, %v2120_v25  ;;  %1671 = vmatpush.xpose.msk.msra.mxu0 %vm252_vm1, %v2138_v29 }
  0x99   :  { %v165_v16 = vpop.f32.mrf.mxu0 }
  0x9a   :  { %v166_v17 = vadd.f32 %v1730_v15, %v165_v16  ;;  %v229_v16 = vrot.slane %v220_v63, 6 }
  0x9c   :  { %1644 = vmatmul.msk.f32.vlgmr.msra.gmra.mxu1 %vm141_vm0, %v166_v17 }
  0x9d   :  { %1673 = vmatpush.xpose.msk.msra.mxu1 %vm252_vm1, %v2132_v28 }
  0x9f   :  { %v168_v18 = vpop.f32.mrf.mxu2 }
  0xa0   :  { %v169_v19 = vadd.f32 %v1730_v15, %v168_v18 }
  0xa1   :  { %1674 = vmatpush.xpose.msk.msra.mxu1 %vm252_vm1, %v2140_v30 }
  0xa2   :  { %1645 = vmatmul.msk.f32.vlgmr.msra.gmra.mxu3 %vm141_vm0, %v169_v19 }
  0xa3   :  { %1655 = vmatpush.xpose.msk.msra.mxu3 %vm252_vm1, %v2118_v24 }
  0xa7   :  { %1656 = vmatpush.xpose.msk.msra.mxu3 %vm252_vm1, %v2126_v26 }
 0x119   :  { %v198_v32 = vpop.f32.mrf.mxu1 }
 0x11a   :  { %1648 = vmatmul.msk.f32.vlgmr.msrb.gmra.mxu2 %vm252_vm1, %v198_v32  ;;  %v206_v33 = vrot.slane %v198_v32, 1  ;;  %v209_v34 = vrot.slane %v198_v32, 4  ;;  %v210_v35 = vrot.slane %v198_v32, 5  ;;  %v207_v42 = vrot.slane %v198_v32, 2 }
 0x11b   :  { %1664 = vmatpush.xpose.msk.msrb.mxu2 %vm252_vm1, %v2146_v31  ;;  %v208_v45 = vrot.slane %v198_v32, 3  ;;  %v211_v51 = vrot.slane %v198_v32, 6  ;;  %v212_v53 = vrot.slane %v198_v32, 7 }
 0x11c   :  { %1651 = vmatmul.msk.f32.vlgmr.msrb.gmra.mxu3 %vm252_vm1, %v206_v33  ;;  %1660 = vmatmul.msk.f32.vlgmr.msrb.gmra.mxu0 %vm252_vm1, %v209_v34 }
 0x11d   :  { %1663 = vmatmul.msk.f32.vlgmr.msrb.gmra.mxu1 %vm252_vm1, %v210_v35  ;;  %1667 = vmatpush.xpose.msk.msrb.mxu3 %vm252_vm1, %v2149_v36 }
 0x11e   :  { %1682 = vmatpush.xpose.msk.msrb.mxu0 %vm252_vm1, %v2153_v37  ;;  %1685 = vmatpush.xpose.msk.msrb.mxu1 %vm252_vm1, %v128_v38 }
 0x11f   :  { %1665 = vmatpush.xpose.msk.msrb.mxu2 %vm252_vm1, %v2157_v39 }
 0x121   :  { %1668 = vmatpush.xpose.msk.msrb.mxu3 %vm252_vm1, %v2162_v40 }
 0x122   :  { %1654 = vmatmul.msk.f32.vlgmr.msra.gmra.mxu2 %vm252_vm1, %v207_v42  ;;  %1683 = vmatpush.xpose.msk.msrb.mxu0 %vm252_vm1, %v2169_v41 }
 0x123   :  { %1676 = vmatpush.xpose.msk.msra.mxu2 %vm252_vm1, %v2171_v43  ;;  %1686 = vmatpush.xpose.msk.msrb.mxu1 %vm252_vm1, %v127_v44 }
 0x124   :  { %1657 = vmatmul.msk.f32.vlgmr.msra.gmra.mxu3 %vm252_vm1, %v208_v45 }
 0x125   :  { %1679 = vmatpush.xpose.msk.msra.mxu3 %vm252_vm1, %v2176_v46  ;;  %v201_v48 = vpop.f32.mrf.mxu3 }
 0x126   :  { %1672 = vmatmul.msk.f32.vlgmr.msra.gmra.mxu0 %vm252_vm1, %v201_v48  ;;  %v213_v50 = vrot.slane %v201_v48, 1  ;;  %v216_v55 = vrot.slane %v201_v48, 4  ;;  %v217_v57 = vrot.slane %v201_v48, 5  ;;  %v214_v58 = vrot.slane %v201_v48, 2 }
 0x127   :  { %1677 = vmatpush.xpose.msk.msra.mxu2 %vm252_vm1, %v2184_v47  ;;  %1103 = vmatpush.msra.mxu0 %v2077_v10  ;;  %v215_v60 = vrot.slane %v201_v48, 3  ;;  %v218_v61 = vrot.slane %v201_v48, 6  ;;  %v219_v62 = vrot.slane %v201_v48, 7  ;;  %v226_v10 = vrot.slane %v220_v63, 3 }
 0x128   :  { %1675 = vmatmul.msk.f32.vlgmr.msra.gmra.mxu1 %vm252_vm1, %v213_v50 }
 0x129   :  { %1680 = vmatpush.xpose.msk.msra.mxu3 %vm252_vm1, %v2188_v49  ;;  %1104 = vmatpush.msra.mxu0 %v2093_v14 }
 0x12a   :  { %1666 = vmatmul.msk.f32.vlgmr.msrb.gmra.mxu2 %vm252_vm1, %v211_v51  ;;  %1126 = vmatpush.msra.mxu1 %v2079_v11 }
 0x12b   :  { %1688 = vmatpush.xpose.msk.msrb.mxu2 %vm252_vm1, %v2195_v52 }
 0x12c   :  { %1669 = vmatmul.msk.f32.vlgmr.msrb.gmra.mxu3 %vm252_vm1, %v212_v53  ;;  %1127 = vmatpush.msra.mxu1 %v2102_v20 }
 0x12d   :  { %1691 = vmatpush.xpose.msk.msrb.mxu3 %vm252_vm1, %v2201_v54 }
 0x12e   :  { %1684 = vmatmul.msk.f32.vlgmr.msrb.gmra.mxu0 %vm252_vm1, %v216_v55 }
 0x12f   :  { %1689 = vmatpush.xpose.msk.msrb.mxu2 %vm252_vm1, %v2207_v56  ;;  %1195 = vmatpush.msrb.mxu0 %v2081_v12 }
 0x130   :  { %1687 = vmatmul.msk.f32.vlgmr.msrb.gmra.mxu1 %vm252_vm1, %v217_v57 }
 0x131   :  { %1692 = vmatpush.xpose.msk.msrb.mxu3 %vm252_vm1, %v2212_v59  ;;  %1196 = vmatpush.msrb.mxu0 %v2104_v21 }
 0x132   :  { %1678 = vmatmul.msk.f32.vlgmr.msra.gmra.mxu2 %vm252_vm1, %v214_v58  ;;  %1218 = vmatpush.msrb.mxu1 %v2087_v13  ;;  %v228_v13 = vrot.slane %v220_v63, 5 }
 0x133   :  { %1149 = vmatpush.msra.mxu2 %v2114_v23  ;;  %v230_v23 = vrot.slane %v220_v63, 7 }
 0x134   :  { %1681 = vmatmul.msk.f32.vlgmr.msra.gmra.mxu3 %vm252_vm1, %v215_v60  ;;  %1219 = vmatpush.msrb.mxu1 %v2106_v22  ;;  %v227_v22 = vrot.slane %v220_v63, 4 }
 0x135   :  { %1172 = vmatpush.msra.mxu3 %v2118_v24  ;;  %1150 = vmatpush.msra.mxu2 %v2120_v25 }
 0x137   :  { %1173 = vmatpush.msra.mxu3 %v2126_v26  ;;  %v221_v26 = vld [vmem:[#allocation5 + $0x8] sm:$0xff] }
 0x138   :  { %v232_v38 = vrot.slane %v221_v26, 2  ;;  %v237_v51 = vrot.slane %v221_v26, 7  ;;  %v231_v60 = vrot.slane %v221_v26, 1 }
 0x13a   :  { %1690 = vmatmul.msk.f32.vlgmr.msrb.gmra.mxu2 %vm252_vm1, %v218_v61 }
 0x13b   :  { %1241 = vmatpush.msrb.mxu2 %v2146_v31 }
 0x13c   :  { %1693 = vmatmul.msk.f32.vlgmr.msrb.gmra.mxu3 %vm252_vm1, %v219_v62  ;;  %v236_v62 = vrot.slane %v221_v26, 6 }
 0x13d   :  { %1264 = vmatpush.msrb.mxu3 %v2149_v36  ;;  %1242 = vmatpush.msrb.mxu2 %v2157_v39  ;;  %v233_v36 = vrot.slane %v221_v26, 3 }
 0x13f   :  { %1265 = vmatpush.msrb.mxu3 %v2162_v40 }
 0x199   :  { %v390_v14 = vpop.f32.mrf.mxu0 }
 0x19a   :  { %v418_v15 = vpop.f32.mrf.mxu1  ;;  %v2262_v34 = vadd.f32 %v390_v14, %v227_v22 }
 0x19b   :  { %v2250_v18 = vadd.f32 %v418_v15, %v228_v13 }
 0x19c   :  { %v714_v45 = vsel %vm701_vm2, %v2262_v34, -inf }
 0x19d   :  { %v278_v0 = vpop.f32.mrf.mxu2  ;;  %v717_v31 = vsel %vm701_vm2, %v2250_v18, -inf }
 0x19e   :  { %v2236_v1 = vadd.f32 %v278_v0, %v220_v63 }
 0x19f   :  { %v306_v2 = vpop.f32.mrf.mxu3 }
 0x1a0   :  { %v702_v4 = vsel %vm701_vm2, %v2236_v1, -inf  ;;  %v2240_v6 = vadd.f32 %v306_v2, %v224_v3 }
 0x1a1   :  { %703 = vmax.xlane.f32.xlu1 %v702_v4  ;;  %v234_v4 = vrot.slane %v221_v26, 4 }
 0x1a2   :  { %v705_v12 = vsel %vm701_vm2, %v2240_v6, -inf }
 0x1a3   :  { %v502_v32 = vpop.f32.mrf.mxu0 }
 0x1a4   :  { %v2260_v33 = vadd.f32 %v502_v32, %v221_v26 }
 0x1a5   :  { %v334_v7 = vpop.f32.mrf.mxu2  ;;  %v530_v57 = vpop.f32.mrf.mxu1 }
 0x1a6   :  { %v2242_v8 = vadd.f32 %v334_v7, %v225_v5  ;;  %v726_v42 = vsel %vm701_vm2, %v2260_v33, -inf  ;;  %v2284_v2 = vadd.f32 %v530_v57, %v231_v60  ;;  %v235_v5 = vrot.slane %v221_v26, 5 }
 0x1a7   :  { %v362_v9 = vpop.f32.mrf.mxu3 }
 0x1a8   :  { %v708_v11 = vsel %vm701_vm2, %v2242_v8, -inf  ;;  %v2248_v17 = vadd.f32 %v362_v9, %v226_v10  ;;  %v729_v7 = vsel %vm701_vm2, %v2284_v2, -inf }
 0x1a9   :  { %709 = vmax.xlane.f32.xlu0 %v708_v11  ;;  %706 = vmax.xlane.f32.xlu1 %v705_v12 }
 0x1aa   :  { %v711_v25 = vsel %vm701_vm2, %v2248_v17, -inf }
 0x1ab   :  { %v614_v10 = vpop.f32.mrf.mxu0 }
 0x1ac   :  { %v2292_v12 = vadd.f32 %v614_v10, %v234_v4 }
 0x1ad   :  { %v446_v19 = vpop.f32.mrf.mxu2  ;;  %v642_v11 = vpop.f32.mrf.mxu1 }
 0x1ae   :  { %v2252_v20 = vadd.f32 %v446_v19, %v229_v16  ;;  %v2294_v13 = vadd.f32 %v642_v11, %v235_v5  ;;  %v738_v14 = vsel %vm701_vm2, %v2292_v12, -inf }
 0x1af   :  { %v474_v21 = vpop.f32.mrf.mxu3 }
 0x1b0   :  { %v720_v24 = vsel %vm701_vm2, %v2252_v20, -inf  ;;  %v2264_v35 = vadd.f32 %v474_v21, %v230_v23  ;;  %v741_v15 = vsel %vm701_vm2, %v2294_v13, -inf }
 0x1b1   :  { %721 = vmax.xlane.f32.xlu2 %v720_v24  ;;  %712 = vmax.xlane.f32.xlu0 %v711_v25 }
 0x1b2   :  { %718 = vmax.xlane.f32.xlu1 %v717_v31  ;;  %v723_v44 = vsel %vm701_vm2, %v2264_v35, -inf }
 0x1b5   :  { %v558_v40 = vpop.f32.mrf.mxu2 }
 0x1b6   :  { %v2274_v50 = vadd.f32 %v558_v40, %v232_v38 }
 0x1b7   :  { %v586_v39 = vpop.f32.mrf.mxu3 }
 0x1b8   :  { %v2272_v48 = vadd.f32 %v586_v39, %v233_v36  ;;  %v732_v53 = vsel %vm701_vm2, %v2274_v50, -inf }
 0x1b9   :  { %724 = vmax.xlane.f32.xlu2 %v723_v44  ;;  %715 = vmax.xlane.f32.xlu0 %v714_v45 }
 0x1ba   :  { %727 = vmax.xlane.f32.xlu1 %v726_v42  ;;  %v735_v55 = vsel %vm701_vm2, %v2272_v48, -inf }
 0x1bd   :  { %v670_v63 = vpop.f32.mrf.mxu2 }
 0x1be   :  { %v2286_v3 = vadd.f32 %v670_v63, %v236_v62 }
 0x1bf   :  { %v698_v58 = vpop.f32.mrf.mxu3 }
 0x1c0   :  { %v2280_v61 = vadd.f32 %v698_v58, %v237_v51  ;;  %v744_v9 = vsel %vm701_vm2, %v2286_v3, -inf }
 0x1c1   :  { %733 = vmax.xlane.f32.xlu2 %v732_v53  ;;  %736 = vmax.xlane.f32.xlu0 %v735_v55 }
 0x1c2   :  { %v747_v0 = vsel %vm701_vm2, %v2280_v61, -inf }
 0x1c3   :  { %748 = vmax.xlane.f32.xlu1 %v747_v0 }
 0x1c9   :  { %730 = vmax.xlane.f32.xlu2 %v729_v7  ;;  %745 = vmax.xlane.f32.xlu0 %v744_v9 }
 0x1d1   :  { %739 = vmax.xlane.f32.xlu2 %v738_v14  ;;  %742 = vmax.xlane.f32.xlu0 %v741_v15 }
 0x214   :  { %v704_v16 = vpop.xlane.xlu1 %703 }
 0x215   :  { %v750_v19 = vsub.f32 %v2236_v1, %v704_v16 }
 0x217   :  { %v766_v21 = vmul.f32 1.442695, %v750_v19 }
 0x219   :  { %1732 = vpow2.f32 %v766_v21 }
 0x21c   :  { %v710_v22 = vpop.xlane.xlu0 %709  ;;  %v707_v23 = vpop.xlane.xlu1 %706 }
 0x21d   :  { %v751_v24 = vsub.f32 %v2240_v6, %v707_v23  ;;  %v752_v31 = vsub.f32 %v2242_v8, %v710_v22 }
 0x21f   :  { %v2302_v25 = vpop.eup %1732  ;;  %v768_v26 = vmul.f32 1.442695, %v751_v24  ;;  %v770_v36 = vmul.f32 1.442695, %v752_v31 }
 0x220   :  { %v798_v32 = vsel %vm701_vm2, %v2302_v25, 0.0 }
 0x221   :  { %799 = vadd.xlane.f32.xlu0 %v798_v32  ;;  %1734 = vpow2.f32 %v768_v26 }
 0x222   :  { %1736 = vpow2.f32 %v770_v36 }
 0x224   :  { %v722_v38 = vpop.xlane.xlu2 %721  ;;  %v713_v39 = vpop.xlane.xlu0 %712 }
 0x225   :  { %v753_v1 = vsub.f32 %v2248_v17, %v713_v39  ;;  %v756_v6 = vsub.f32 %v2252_v20, %v722_v38  ;;  %v719_v8 = vpop.xlane.xlu1 %718 }
 0x226   :  { %v755_v20 = vsub.f32 %v2250_v18, %v719_v8 }
 0x227   :  { %v772_v40 = vmul.f32 1.442695, %v753_v1  ;;  %v2308_v42 = vpop.eup %1734  ;;  %v778_v45 = vmul.f32 1.442695, %v756_v6 }
 0x228   :  { %v801_v44 = vsel %vm701_vm2, %v2308_v42, 0.0  ;;  %v2315_v17 = vpop.eup %1736 }
 0x229   :  { %1738 = vpow2.f32 %v772_v40  ;;  %802 = vadd.xlane.f32.xlu1 %v801_v44  ;;  %v804_v0 = vsel %vm701_vm2, %v2315_v17, 0.0 }
 0x22a   :  { %1740 = vpow2.f32 %v778_v45 }
 0x22c   :  { %v725_v51 = vpop.xlane.xlu2 %724  ;;  %v716_v53 = vpop.xlane.xlu0 %715 }
 0x22d   :  { %v757_v55 = vsub.f32 %v2264_v35, %v725_v51  ;;  %v754_v57 = vsub.f32 %v2262_v34, %v716_v53  ;;  %v776_v34 = vmul.f32 1.442695, %v755_v20  ;;  %v728_v5 = vpop.xlane.xlu1 %727 }
 0x22e   :  { %v758_v16 = vsub.f32 %v2260_v33, %v728_v5 }
 0x22f   :  { %v780_v58 = vmul.f32 1.442695, %v757_v55  ;;  %v774_v60 = vmul.f32 1.442695, %v754_v57  ;;  %v2317_v62 = vpop.eup %1738 }
 0x230   :  { %v807_v63 = vsel %vm701_vm2, %v2317_v62, 0.0  ;;  %v2326_v10 = vpop.eup %1740  ;;  %v782_v21 = vmul.f32 1.442695, %v758_v16 }
 0x231   :  { %1742 = vpow2.f32 %v780_v58  ;;  %808 = vadd.xlane.f32.xlu2 %v807_v63  ;;  %805 = vadd.xlane.f32.xlu1 %v804_v0 }
 0x232   :  { %1744 = vpow2.f32 %v774_v60 }
 0x233   :  { %1746 = vpow2.f32 %v776_v34 }
 0x234   :  { %v734_v35 = vpop.xlane.xlu2 %733  ;;  %v737_v4 = vpop.xlane.xlu0 %736 }
 0x235   :  { %v760_v7 = vsub.f32 %v2274_v50, %v734_v35  ;;  %v761_v9 = vsub.f32 %v2272_v48, %v737_v4  ;;  %v816_v50 = vsel %vm701_vm2, %v2326_v10, 0.0 }
 0x236   :  { %v749_v24 = vpop.xlane.xlu1 %748 }
 0x237   :  { %v2328_v18 = vpop.eup %1742  ;;  %v786_v11 = vmul.f32 1.442695, %v760_v7  ;;  %v788_v14 = vmul.f32 1.442695, %v761_v9  ;;  %v765_v1 = vsub.f32 %v2280_v61, %v749_v24 }
 0x238   :  { %v2330_v15 = vpop.eup %1744  ;;  %v819_v19 = vsel %vm701_vm2, %v2328_v18, 0.0 }
 0x239   :  { %1748 = vpow2.f32 %v786_v11  ;;  %820 = vadd.xlane.f32.xlu0 %v819_v19  ;;  %v810_v48 = vsel %vm701_vm2, %v2330_v15, 0.0  ;;  %817 = vadd.xlane.f32.xlu2 %v816_v50  ;;  %v2341_v31 = vpop.eup %1746  ;;  %v796_v6 = vmul.f32 1.442695, %v765_v1 }
 0x23a   :  { %1750 = vpow2.f32 %v788_v14  ;;  %811 = vadd.xlane.f32.xlu1 %v810_v48 }
 0x23b   :  { %1752 = vpow2.f32 %v782_v21 }
 0x23c   :  { %v731_v22 = vpop.xlane.xlu2 %730  ;;  %v746_v23 = vpop.xlane.xlu0 %745 }
 0x23d   :  { %v759_v33 = vsub.f32 %v2284_v2, %v731_v22  ;;  %v764_v26 = vsub.f32 %v2286_v3, %v746_v23  ;;  %v813_v3 = vsel %vm701_vm2, %v2341_v31, 0.0 }
 0x23f   :  { %v2343_v32 = vpop.eup %1748  ;;  %v784_v36 = vmul.f32 1.442695, %v759_v33  ;;  %v794_v38 = vmul.f32 1.442695, %v764_v26 }
 0x240   :  { %v2345_v39 = vpop.eup %1750  ;;  %v828_v40 = vsel %vm701_vm2, %v2343_v32, 0.0 }
 0x241   :  { %1754 = vpow2.f32 %v784_v36  ;;  %829 = vadd.xlane.f32.xlu0 %v828_v40  ;;  %v831_v2 = vsel %vm701_vm2, %v2345_v39, 0.0  ;;  %814 = vadd.xlane.f32.xlu2 %v813_v3  ;;  %v2356_v51 = vpop.eup %1752 }
 0x242   :  { %1756 = vpow2.f32 %v794_v38  ;;  %832 = vadd.xlane.f32.xlu1 %v831_v2 }
 0x243   :  { %1758 = vpow2.f32 %v796_v6 }
 0x244   :  { %v740_v44 = vpop.xlane.xlu2 %739  ;;  %v743_v8 = vpop.xlane.xlu0 %742 }
 0x245   :  { %v762_v45 = vsub.f32 %v2292_v12, %v740_v44  ;;  %v763_v61 = vsub.f32 %v2294_v13, %v743_v8  ;;  %v822_v12 = vsel %vm701_vm2, %v2356_v51, 0.0 }
 0x247   :  { %v2358_v53 = vpop.eup %1754  ;;  %v790_v55 = vmul.f32 1.442695, %v762_v45  ;;  %v792_v57 = vmul.f32 1.442695, %v763_v61 }
 0x248   :  { %v2360_v58 = vpop.eup %1756  ;;  %v825_v60 = vsel %vm701_vm2, %v2358_v53, 0.0 }
 0x249   :  { %1760 = vpow2.f32 %v790_v55  ;;  %826 = vadd.xlane.f32.xlu0 %v825_v60  ;;  %v840_v20 = vsel %vm701_vm2, %v2360_v58, 0.0  ;;  %823 = vadd.xlane.f32.xlu2 %v822_v12  ;;  %v2368_v13 = vpop.eup %1758 }
 0x24a   :  { %1762 = vpow2.f32 %v792_v57  ;;  %841 = vadd.xlane.f32.xlu1 %v840_v20  ;;  %v843_v4 = vsel %vm701_vm2, %v2368_v13, 0.0 }
 0x24f   :  { %v2370_v63 = vpop.eup %1760 }
 0x250   :  { %v2372_v0 = vpop.eup %1762  ;;  %v834_v34 = vsel %vm701_vm2, %v2370_v63, 0.0 }
 0x251   :  { %835 = vadd.xlane.f32.xlu0 %v834_v34  ;;  %v837_v35 = vsel %vm701_vm2, %v2372_v0, 0.0  ;;  %844 = vadd.xlane.f32.xlu2 %v843_v4 }
 0x252   :  { %838 = vadd.xlane.f32.xlu1 %v837_v35 }
 0x294   :  { %v800_v5 = vpop.xlane.xlu0 %799 }
 0x295   :  { %1764 = vrcp.f32 %v800_v5  ;;  %v857_v16 = vand.u32 2147483648, %v800_v5  ;;  %v855_v50 = vand.u32 2147483647, %v800_v5  ;;  %vm851_vm4 = vweird.f32 %v800_v5 }
 0x297   :  { %v858_v21 = vor.u32 1.1754944e-38, %v857_v16  ;;  %vm856_vm6 = vcmp.eq.f32.partialorder %v855_v50, 8.507059e+37 }
 0x29b   :  { %v1765_v7 = vpop.eup %1764 }
 0x29c   :  { %v847_v9 = vmul.f32 %v1765_v7, %v800_v5  ;;  %v803_v11 = vpop.xlane.xlu1 %802  ;;  %vm852_vm3 = vweird.f32 %v1765_v7 }
 0x29d   :  { %1766 = vrcp.f32 %v803_v11  ;;  %vm853_vm5 = vmor %vm851_vm4, %vm852_vm3  ;;  %v872_v2 = vand.u32 2147483648, %v803_v11  ;;  %vm866_vm8 = vweird.f32 %v803_v11  ;;  %v870_v6 = vand.u32 2147483647, %v803_v11 }
 0x29e   :  { %v848_v14 = vsub.f32 1.0, %v847_v9 }
 0x29f   :  { %vm871_vm10 = vcmp.eq.f32.partialorder %v870_v6, 8.507059e+37 }
 0x2a0   :  { %v849_v19 = vmul.f32 %v1765_v7, %v848_v14 }
 0x2a2   :  { %v850_v48 = vadd.f32 %v1765_v7, %v849_v19 }
 0x2a3   :  { %v1767_v22 = vpop.eup %1766 }
 0x2a4   :  { %v854_v23 = vsel %vm853_vm5, %v1765_v7, %v850_v48  ;;  %v862_v33 = vmul.f32 %v1767_v22, %v803_v11  ;;  %v2380_v26 = vpop.xlane.xlu2 %808  ;;  %v2382_v36 = vpop.xlane.xlu1 %805  ;;  %vm867_vm7 = vweird.f32 %v1767_v22 }
 0x2a5   :  { %v859_v24 = vsel %vm856_vm6, %v858_v21, %v854_v23  ;;  %1768 = vrcp.f32 %v2380_v26  ;;  %vm2394_vm9 = vmor %vm866_vm8, %vm867_vm7  ;;  %v900_v34 = vand.u32 2147483647, %v2380_v26  ;;  %v902_v35 = vand.u32 2147483648, %v2380_v26 }
 0x2a6   :  { %v863_v38 = vsub.f32 1.0, %v862_v33  ;;  %1770 = vrcp.f32 %v2382_v36  ;;  %v2387_v1 = vmul.f32 %v2302_v25, %v859_v24  ;;  %v885_v7 = vand.u32 2147483647, %v2382_v36 }
 0x2a7   :  { %v887_v9 = vand.u32 2147483648, %v2382_v36  ;;  %vm896_vm11 = vweird.f32 %v2380_v26  ;;  %vm881_vm12 = vweird.f32 %v2382_v36  ;;  %vm2426_vm13 = vcmp.eq.f32.partialorder %v900_v34, 8.507059e+37 }
 0x2a8   :  { %v864_v40 = vmul.f32 %v1767_v22, %v863_v38  ;;  %1694 = vmatmul.msk.f32.vlgmr.msra.gmra.mxu0 %vm252_vm1, %v2387_v1  ;;  %v903_v19 = vor.u32 1.1754944e-38, %v902_v35  ;;  %vm2438_vm15 = vcmp.eq.f32.partialorder %v885_v7, 8.507059e+37 }
 0x2a9   :  { %1287 = vmatpush.msra.mxu0 %v2130_v27  ;;  %v873_v27 = vor.u32 1.1754944e-38, %v872_v2 }
 0x2aa   :  { %v865_v3 = vadd.f32 %v1767_v22, %v864_v40 }
 0x2ab   :  { %v2392_v44 = vpop.eup %1768  ;;  %1288 = vmatpush.msra.mxu0 %v2138_v29 }
 0x2ac   :  { %v2398_v45 = vpop.xlane.xlu0 %820  ;;  %v2400_v25 = vpop.eup %1770  ;;  %v869_v61 = vsel %vm2394_vm9, %v1767_v22, %v865_v3  ;;  %v892_v55 = vmul.f32 %v2392_v44, %v2380_v26  ;;  %vm897_vm14 = vweird.f32 %v2392_v44 }
 0x2ad   :  { %v2406_v57 = vpop.xlane.xlu2 %817  ;;  %1772 = vrcp.f32 %v2398_v45  ;;  %v877_v60 = vmul.f32 %v2400_v25, %v2382_v36  ;;  %v2413_v20 = vpop.xlane.xlu1 %811  ;;  %v874_v4 = vsel %vm871_vm10, %v873_v27, %v869_v61  ;;  %vm882_vm2 = vweird.f32 %v2400_v25  ;;  %vm2464_vm4 = vmor %vm896_vm11, %vm897_vm14 }
 0x2ae   :  { %1774 = vrcp.f32 %v2406_v57  ;;  %v893_v12 = vsub.f32 1.0, %v892_v55  ;;  %v947_v50 = vand.u32 2147483648, %v2406_v57  ;;  %v2432_v48 = vmul.f32 %v2308_v42, %v874_v4  ;;  %vm2480_vm6 = vmor %vm881_vm12, %vm882_vm2 }
 0x2af   :  { %v878_v5 = vsub.f32 1.0, %v877_v60  ;;  %1776 = vrcp.f32 %v2413_v20  ;;  %v888_v42 = vor.u32 1.1754944e-38, %v887_v9  ;;  %v945_v2 = vand.u32 2147483647, %v2406_v57 }
 0x2b0   :  { %v894_v29 = vmul.f32 %v2392_v44, %v893_v12  ;;  %1695 = vmatmul.msk.f32.vlgmr.msra.gmra.mxu1 %vm252_vm1, %v2432_v48  ;;  %vm956_vm3 = vweird.f32 %v2398_v45  ;;  %v960_v6 = vand.u32 2147483647, %v2398_v45  ;;  %vm941_vm5 = vweird.f32 %v2406_v57 }
 0x2b1   :  { %v879_v11 = vmul.f32 %v2400_v25, %v878_v5  ;;  %1310 = vmatpush.msra.mxu1 %v2132_v28  ;;  %v2469_v60 = vor.u32 1.1754944e-38, %v947_v50  ;;  %v962_v12 = vand.u32 2147483648, %v2398_v45  ;;  %v915_v4 = vand.u32 2147483647, %v2413_v20 }
 0x2b2   :  { %v895_v22 = vadd.f32 %v2392_v44, %v894_v29  ;;  %v917_v36 = vand.u32 2147483648, %v2413_v20  ;;  %vm2499_vm8 = vcmp.eq.f32.partialorder %v960_v6, 8.507059e+37  ;;  %vm2506_vm10 = vcmp.eq.f32.partialorder %v945_v2, 8.507059e+37 }
 0x2b3   :  { %v2424_v14 = vpop.eup %1772  ;;  %v880_v38 = vadd.f32 %v2400_v25, %v879_v11  ;;  %1311 = vmatpush.msra.mxu1 %v2140_v30  ;;  %v963_v50 = vor.u32 1.1754944e-38, %v962_v12  ;;  %vm911_vm11 = vweird.f32 %v2413_v20  ;;  %vm2514_vm12 = vcmp.eq.f32.partialorder %v915_v4, 8.507059e+37 }
 0x2b4   :  { %v2434_v21 = vpop.eup %1774  ;;  %v952_v24 = vmul.f32 %v2424_v14, %v2398_v45  ;;  %v2444_v33 = vpop.xlane.xlu0 %829  ;;  %v899_v28 = vsel %vm2464_vm4, %v2392_v44, %v895_v22  ;;  %vm957_vm7 = vweird.f32 %v2424_v14  ;;  %v1571_v2 = vrot.slane %v2432_v48, 7 }
 0x2b5   :  { %v937_v40 = vmul.f32 %v2434_v21, %v2406_v57  ;;  %v2455_v8 = vpop.xlane.xlu2 %814  ;;  %v2458_v61 = vpop.eup %1776  ;;  %1778 = vrcp.f32 %v2444_v33  ;;  %v884_v44 = vsel %vm2480_vm6, %v2400_v25, %v880_v38  ;;  %v904_v25 = vsel %vm2426_vm13, %v903_v19, %v899_v28  ;;  %vm2527_vm13 = vmor %vm956_vm3, %vm957_vm7 }
 0x2b6   :  { %v953_v3 = vsub.f32 1.0, %v952_v24  ;;  %v907_v35 = vmul.f32 %v2458_v61, %v2413_v20  ;;  %1780 = vrcp.f32 %v2455_v8  ;;  %v2495_v7 = vpop.xlane.xlu1 %832  ;;  %vm942_vm9 = vweird.f32 %v2434_v21 }
 0x2b7   :  { %v938_v27 = vsub.f32 1.0, %v937_v40  ;;  %v889_v22 = vsel %vm2438_vm15, %v888_v42, %v884_v44  ;;  %v1007_v16 = vand.u32 2147483648, %v2444_v33  ;;  %1782 = vrcp.f32 %v2495_v7  ;;  %vm2556_vm2 = vmor %vm941_vm5, %vm942_vm9 }
 0x2b8   :  { %v954_v34 = vmul.f32 %v2424_v14, %v953_v3  ;;  %v908_v30 = vsub.f32 1.0, %v907_v35  ;;  %v918_v42 = vor.u32 1.1754944e-38, %v917_v36  ;;  %v1005_v3 = vand.u32 2147483647, %v2444_v33 }
 0x2b9   :  { %v939_v5 = vmul.f32 %v2434_v21, %v938_v27  ;;  %vm912_vm14 = vweird.f32 %v2458_v61  ;;  %vm1001_vm15 = vweird.f32 %v2444_v33  ;;  %v932_v12 = vand.u32 2147483648, %v2455_v8 }
 0x2ba   :  { %v955_v29 = vadd.f32 %v2424_v14, %v954_v34  ;;  %v909_v24 = vmul.f32 %v2458_v61, %v908_v30  ;;  %v2545_v28 = vmul.f32 %v2315_v17, %v889_v22  ;;  %v2548_v26 = vmul.f32 %v2317_v62, %v904_v25  ;;  %vm2574_vm3 = vmor %vm911_vm11, %vm912_vm14 }
 0x2bb   :  { %v2520_v19 = vpop.eup %1778  ;;  %v940_v40 = vadd.f32 %v2434_v21, %v939_v5  ;;  %v1008_v4 = vor.u32 1.1754944e-38, %v1007_v16  ;;  %v930_v17 = vand.u32 2147483647, %v2455_v8  ;;  %vm2579_vm5 = vcmp.eq.f32.partialorder %v1005_v3, 8.507059e+37 }
 0x2bc   :  { %v959_v6 = vsel %vm2527_vm13, %v2424_v14, %v955_v29  ;;  %v910_v55 = vadd.f32 %v2458_v61, %v909_v24  ;;  %v997_v45 = vmul.f32 %v2520_v19, %v2444_v33  ;;  %v2540_v27 = vpop.eup %1780  ;;  %v2550_v14 = vpop.xlane.xlu0 %826  ;;  %vm1002_vm4 = vweird.f32 %v2520_v19  ;;  %1696 = vmatmul.msk.f32.vlgmr.msra.gmra.mxu2 %vm252_vm1, %v2545_v28  ;;  %1697 = vmatmul.msk.f32.vlgmr.msra.gmra.mxu3 %vm252_vm1, %v2548_v26 }
 0x2bd   :  { %v922_v44 = vmul.f32 %v2540_v27, %v2455_v8  ;;  %v944_v62 = vsel %vm2556_vm2, %v2434_v21, %v940_v40  ;;  %v2568_v5 = vsel %vm2499_vm8, %v963_v50, %v959_v6  ;;  %vm926_vm6 = vweird.f32 %v2455_v8  ;;  %v2589_v20 = vpop.xlane.xlu2 %823  ;;  %v2591_v29 = vpop.eup %1782  ;;  %1333 = vmatpush.msra.mxu2 %v2171_v43  ;;  %1356 = vmatpush.msra.mxu3 %v2176_v46  ;;  %vm2622_vm8 = vmor %vm1001_vm15, %vm1002_vm4 }
 0x2be   :  { %v998_v35 = vsub.f32 1.0, %v997_v45  ;;  %v1022_v21 = vand.u32 2147483648, %v2495_v7  ;;  %v914_v9 = vsel %vm2574_vm3, %v2458_v61, %v910_v55  ;;  %1784 = vrcp.f32 %v2550_v14  ;;  %v2612_v43 = vpop.xlane.xlu1 %841 }
 0x2bf   :  { %v923_v25 = vsub.f32 1.0, %v922_v44  ;;  %v2600_v50 = vor.u32 1.1754944e-38, %v932_v12  ;;  %v1012_v22 = vmul.f32 %v2591_v29, %v2495_v7  ;;  %vm1016_vm7 = vweird.f32 %v2495_v7  ;;  %1334 = vmatpush.msra.mxu2 %v2184_v47  ;;  %1357 = vmatpush.msra.mxu3 %v2188_v49 }
 0x2c0   :  { %v999_v30 = vmul.f32 %v2520_v19, %v998_v35  ;;  %v1020_v24 = vand.u32 2147483647, %v2495_v7  ;;  %v949_v61 = vsel %vm2506_vm10, %v2469_v60, %v944_v62  ;;  %1786 = vrcp.f32 %v2589_v20 }
 0x2c1   :  { %v924_v40 = vmul.f32 %v2540_v27, %v923_v25  ;;  %v919_v46 = vsel %vm2514_vm12, %v918_v42, %v914_v9  ;;  %vm927_vm9 = vweird.f32 %v2540_v27  ;;  %vm2627_vm10 = vcmp.eq.f32.partialorder %v930_v17, 8.507059e+37 }
 0x2c2   :  { %v1000_v16 = vadd.f32 %v2520_v19, %v999_v30  ;;  %v1013_v47 = vsub.f32 1.0, %v1012_v22  ;;  %v992_v49 = vand.u32 2147483648, %v2550_v14  ;;  %v1023_v23 = vor.u32 1.1754944e-38, %v1022_v21  ;;  %vm2667_vm15 = vmor %vm926_vm6, %vm927_vm9 }
 0x2c3   :  { %v1573_v33 = vrot.slane %v2545_v28, 6  ;;  %v990_v42 = vand.u32 2147483647, %v2550_v14  ;;  %v925_v3 = vadd.f32 %v2540_v27, %v924_v40  ;;  %vm2639_vm11 = vcmp.eq.f32.partialorder %v1020_v24, 8.507059e+37 }
 0x2c4   :  { %v1004_v38 = vsel %vm2622_vm8, %v2520_v19, %v1000_v16  ;;  %v1014_v6 = vmul.f32 %v2591_v29, %v1013_v47  ;;  %v977_v45 = vand.u32 2147483648, %v2589_v20  ;;  %1788 = vrcp.f32 %v2612_v43  ;;  %v2645_v12 = vpop.eup %1784  ;;  %v2678_v22 = vpop.xlane.xlu0 %835 }
 0x2c5   :  { %vm1017_vm12 = vweird.f32 %v2591_v29  ;;  %v1575_v19 = vrot.slane %v2548_v26, 5  ;;  %vm986_vm13 = vweird.f32 %v2550_v14  ;;  %v975_v34 = vand.u32 2147483647, %v2589_v20  ;;  %v2711_v16 = vpop.xlane.xlu2 %844 }
 0x2c6   :  { %v1015_v35 = vadd.f32 %v2591_v29, %v1014_v6  ;;  %v982_v44 = vmul.f32 %v2645_v12, %v2550_v14  ;;  %v2654_v17 = vor.u32 1.1754944e-38, %v992_v49  ;;  %vm971_vm14 = vweird.f32 %v2589_v20  ;;  %v2657_v62 = vpop.eup %1786  ;;  %vm2687_vm2 = vmor %vm1016_vm7, %vm1017_vm12 }
 0x2c7   :  { %v2661_v57 = vsel %vm2579_vm5, %v1008_v4, %v1004_v38  ;;  %v1065_v9 = vand.u32 2147483647, %v2612_v43  ;;  %v2673_v30 = vmul.f32 %v2330_v15, %v919_v46  ;;  %v2676_v25 = vmul.f32 %v2326_v10, %v949_v61 }
 0x2c8   :  { %v929_v4 = vsel %vm2667_vm15, %v2540_v27, %v925_v3  ;;  %v983_v36 = vsub.f32 1.0, %v982_v44  ;;  %vm2691_vm3 = vcmp.eq.f32.partialorder %v990_v42, 8.507059e+37  ;;  %v967_v10 = vmul.f32 %v2657_v62, %v2589_v20 }
 0x2c9   :  { %v978_v24 = vor.u32 1.1754944e-38, %v977_v45  ;;  %v1019_v27 = vsel %vm2687_vm2, %v2591_v29, %v1015_v35  ;;  %vm987_vm4 = vweird.f32 %v2645_v12  ;;  %vm2701_vm5 = vcmp.eq.f32.partialorder %v975_v34, 8.507059e+37  ;;  %1698 = vmatmul.msk.f32.vlgmr.msrb.gmra.mxu0 %vm252_vm1, %v2673_v30  ;;  %1700 = vmatmul.msk.f32.vlgmr.msrb.gmra.mxu2 %vm252_vm1, %v2676_v25 }
 0x2ca   :  { %vm1061_vm6 = vweird.f32 %v2612_v43  ;;  %v1067_v61 = vand.u32 2147483648, %v2612_v43  ;;  %v1789_v40 = vpop.eup %1788  ;;  %v984_v29 = vmul.f32 %v2645_v12, %v983_v36  ;;  %v968_v46 = vsub.f32 1.0, %v967_v10  ;;  %1425 = vmatpush.msrb.mxu2 %v2195_v52  ;;  %1379 = vmatpush.msrb.mxu0 %v2153_v37  ;;  %v2736_v52 = vpop.xlane.xlu1 %838  ;;  %vm2745_vm9 = vmor %vm986_vm13, %vm987_vm4 }
 0x2cb   :  { %v2716_v60 = vmul.f32 %v2328_v18, %v2568_v5  ;;  %1790 = vrcp.f32 %v2678_v22  ;;  %v934_v47 = vsel %vm2627_vm10, %v2600_v50, %v929_v4  ;;  %vm972_vm7 = vweird.f32 %v2657_v62  ;;  %v1455_v4 = vld [vmem:[#allocation7 + $0x8] sm:$0xff] }
 0x2cc   :  { %v1057_v49 = vmul.f32 %v1789_v40, %v2612_v43  ;;  %vm2726_vm8 = vcmp.eq.f32.partialorder %v1065_v9, 8.507059e+37  ;;  %v985_v18 = vadd.f32 %v2645_v12, %v984_v29  ;;  %v969_v5 = vmul.f32 %v2657_v62, %v968_v46  ;;  %1426 = vmatpush.msrb.mxu2 %v2207_v56  ;;  %1380 = vmatpush.msrb.mxu0 %v2169_v41  ;;  %vm2761_vm12 = vmor %vm971_vm14, %vm972_vm7 }
 0x2cd   :  { %1701 = vmatmul.msk.f32.vlgmr.msrb.gmra.mxu3 %vm252_vm1, %v2716_v60  ;;  %v1037_v37 = vand.u32 2147483648, %v2678_v22  ;;  %1792 = vrcp.f32 %v2711_v16  ;;  %v1024_v50 = vsel %vm2639_vm11, %v1023_v23, %v1019_v27  ;;  %v1068_v3 = vor.u32 1.1754944e-38, %v1067_v61 }
 0x2ce   :  { %v1058_v42 = vsub.f32 1.0, %v1057_v49  ;;  %v1035_v6 = vand.u32 2147483647, %v2678_v22  ;;  %1448 = vmatpush.msrb.mxu3 %v2201_v54  ;;  %vm1477_vm10 = vcmask 1041409   ;;  %v989_v56 = vsel %vm2745_vm9, %v2645_v12, %v985_v18 }
 0x2cf   :  { %v970_v23 = vadd.f32 %v2657_v62, %v969_v5  ;;  %vm1062_vm11 = vweird.f32 %v1789_v40  ;;  %v1577_v14 = vrot.slane %v2673_v30, 4  ;;  %v1080_v41 = vand.u32 2147483647, %v2711_v16 }
 0x2d0   :  { %v1059_v54 = vmul.f32 %v1789_v40, %v1058_v42  ;;  %v1082_v45 = vand.u32 2147483648, %v2711_v16  ;;  %1794 = vrcp.f32 %v2736_v52  ;;  %1449 = vmatpush.msrb.mxu3 %v2212_v59  ;;  %v1581_v20 = vrot.slane %v2676_v25, 2  ;;  %vm1063_vm2 = vmor %vm1061_vm6, %vm1062_vm11 }
 0x2d1   :  { %v1791_v12 = vpop.eup %1790  ;;  %v974_v34 = vsel %vm2761_vm12, %v2657_v62, %v970_v23  ;;  %vm1031_vm13 = vweird.f32 %v2678_v22  ;;  %v1038_v35 = vor.u32 1.1754944e-38, %v1037_v37  ;;  %v994_v44 = vsel %vm2691_vm3, %v2654_v17, %v989_v56 }
 0x2d2   :  { %v1060_v21 = vadd.f32 %v1789_v40, %v1059_v54  ;;  %v1027_v9 = vmul.f32 %v1791_v12, %v2678_v22  ;;  %vm2778_vm14 = vcmp.eq.f32.partialorder %v1035_v6, 8.507059e+37  ;;  %vm1076_vm15 = vweird.f32 %v2711_v16 }
 0x2d3   :  { %v1050_v59 = vand.u32 2147483647, %v2736_v52  ;;  %v1793_v62 = vpop.eup %1792  ;;  %v979_v8 = vsel %vm2701_vm5, %v978_v24, %v974_v34  ;;  %v1052_v17 = vand.u32 2147483648, %v2736_v52  ;;  %v2791_v36 = vmul.f32 %v2341_v31, %v934_v47  ;;  %v1800_v47 = vld [vmem:[#allocation2 + $0xd8] sm:$0xff] }
 0x2d4   :  { %v1010_v15 = vmul.f32 %v2343_v32, %v2661_v57  ;;  %v1064_v10 = vsel %vm1063_vm2, %v1789_v40, %v1060_v21  ;;  %v1028_v27 = vsub.f32 1.0, %v1027_v9  ;;  %v1072_v61 = vmul.f32 %v1793_v62, %v2711_v16 }
 0x2d5   :  { %vm2796_vm3 = vcmp.eq.f32.partialorder %v1080_v41, 8.507059e+37  ;;  %v1083_v24 = vor.u32 1.1754944e-38, %v1082_v45  ;;  %v1069_v43 = vsel %vm2726_vm8, %v1068_v3, %v1064_v10  ;;  %vm1032_vm4 = vweird.f32 %v1791_v12  ;;  %1699 = vmatmul.msk.f32.vlgmr.msrb.gmra.mxu1 %vm252_vm1, %v2791_v36  ;;  %v1801_v3 = vld [vmem:[#allocation2 + $0xd0] sm:$0xff] }
 0x2d6   :  { %vm1077_vm5 = vweird.f32 %v1793_v62  ;;  %vm1046_vm6 = vweird.f32 %v2736_v52  ;;  %v1053_v31 = vor.u32 1.1754944e-38, %v1052_v17  ;;  %1704 = vmatmul.msk.f32.vlgmr.msra.gmra.mxu2 %vm252_vm1, %v1010_v15  ;;  %v1795_v32 = vpop.eup %1794  ;;  %v1029_v57 = vmul.f32 %v1791_v12, %v1028_v27  ;;  %1402 = vmatpush.msrb.mxu1 %v1800_v47  ;;  %vm1033_vm9 = vmor %vm1031_vm13, %vm1032_vm4  ;;  %v1538_v17 = vld [vmem:[#allocation8] sm:$0xff] }
 0x2d7   :  { %v1073_v7 = vsub.f32 1.0, %v1072_v61  ;;  %v1025_v40 = vmul.f32 %v2345_v39, %v1024_v50  ;;  %v980_v46 = vmul.f32 %v2356_v51, %v979_v8  ;;  %v1042_v49 = vmul.f32 %v1795_v32, %v2736_v52  ;;  %vm1078_vm13 = vmor %vm1076_vm15, %vm1077_vm5  ;;  %v1539_v8 = vld [vmem:[#allocation8 + $0x8] sm:$0xff] }
 0x2d8   :  { %vm2809_vm7 = vcmp.eq.f32.partialorder %v1050_v59, 8.507059e+37  ;;  %v1579_v18 = vrot.slane %v2791_v36, 3  ;;  %v1587_v5 = vrot.slane %v1010_v15, 6  ;;  %v995_v37 = vmul.f32 %v2358_v53, %v994_v44  ;;  %1403 = vmatpush.msrb.mxu1 %v1801_v3  ;;  %v1540_v59 = vld [vmem:[#allocation8 + $0x10] sm:$0xff]  ;;  %v1802_v36 = vld [vmem:[%s2910_s0] sm:$0xff]  ;;  %v1803_v61 = vld [vmem:[%s2910_s0 + $0x8] sm:$0xff] }
 0x2d9   :  { %v1030_v11 = vadd.f32 %v1791_v12, %v1029_v57  ;;  %v1074_v42 = vmul.f32 %v1793_v62, %v1073_v7  ;;  %vm1047_vm8 = vweird.f32 %v1795_v32  ;;  %1705 = vmatmul.msk.f32.vlgmr.msra.gmra.mxu3 %vm252_vm1, %v1025_v40  ;;  %1702 = vmatmul.msk.f32.vlgmr.msra.gmra.mxu0 %vm252_vm1, %v980_v46  ;;  %v1070_v39 = vmul.f32 %v2360_v58, %v1069_v43  ;;  %s1964_s0 = smov [#allocation11]  }
 0x2da   :  { %v1043_v51 = vsub.f32 1.0, %v1042_v49  ;;  %v1585_v50 = vrot.slane %v995_v37, 7  ;;  %v1572_v53 = vsel %vm1477_vm10, %v1571_v2, %v2387_v1  ;;  %vm1480_vm11 = vcmask 1042434   ;;  %vm1048_vm15 = vmor %vm1046_vm6, %vm1047_vm8  ;;  %1529 = vmatpush.msra.mxu0 %v1455_v4  ;;  %s1620_s12 = sshll.u32 %s1964_s0, 4  ;;  %s1621_s12 = int_to_ptr.vmem [resolvable:$true] %s1620_s12 }
 0x2db   :  { %v1034_v6 = vsel %vm1033_vm9, %v1791_v12, %v1030_v11  ;;  %v1075_v56 = vadd.f32 %v1793_v62, %v1074_v42  ;;  %v1574_v58 = vsel %vm1480_vm11, %v1573_v33, %v1572_v53  ;;  %vm1483_vm12 = vcmask 1043459  }
 0x2dc   :  { %v1039_v22 = vsel %vm2778_vm14, %v1038_v35, %v1034_v6  ;;  %v1044_v23 = vmul.f32 %v1795_v32, %v1043_v51  ;;  %v1589_v55 = vrot.slane %v1025_v40, 5  ;;  %v1586_v48 = vsel %vm1477_vm10, %v1585_v50, %v980_v46 }
 0x2dd   :  { %v1040_v1 = vmul.f32 %v2370_v63, %v1039_v22  ;;  %v1079_v2 = vsel %vm1078_vm13, %v1793_v62, %v1075_v56  ;;  %v1576_v28 = vsel %vm1483_vm12, %v1575_v19, %v1574_v58  ;;  %vm1486_vm2 = vcmask 1044484   ;;  %1703 = vmatmul.msk.f32.vlgmr.msra.gmra.mxu1 %vm252_vm1, %v995_v37  ;;  %v1454_v62 = vld [vmem:[#allocation7] sm:$0xff] }
 0x2de   :  { %v1084_v33 = vsel %vm2796_vm3, %v1083_v24, %v1079_v2  ;;  %v1045_v54 = vadd.f32 %v1795_v32, %v1044_v23  ;;  %1708 = vmatmul.msk.f32.vlgmr.msrb.gmra.mxu2 %vm252_vm1, %v1070_v39  ;;  %v1588_v16 = vsel %vm1480_vm11, %v1587_v5, %v1586_v48  ;;  %vm1489_vm14 = vcmask 1045509   ;;  %1530 = vmatpush.msra.mxu0 %v1454_v62 }
 0x2df   :  { %v1591_v41 = vrot.slane %v1040_v1, 4  ;;  %v1085_v63 = vmul.f32 %v2368_v13, %v1084_v33  ;;  %v1578_v26 = vsel %vm1486_vm2, %v1577_v14, %v1576_v28  ;;  %vm1492_vm3 = vcmask 1046534  }
 0x2e0   :  { %v1049_v19 = vsel %vm1048_vm15, %v1795_v32, %v1045_v54  ;;  %vm1495_vm4 = vcmask 1047559   ;;  %v1580_v45 = vsel %vm1489_vm14, %v1579_v18, %v1578_v26  ;;  %v1583_v12 = vrot.slane %v2716_v60, 1 }
 0x2e1   :  { %v1054_v34 = vsel %vm2809_vm7, %v1053_v31, %v1049_v19  ;;  %1706 = vmatmul.msk.f32.vlgmr.msrb.gmra.mxu0 %vm252_vm1, %v1040_v1  ;;  %1709 = vmatmul.msk.f32.vlgmr.msrb.gmra.mxu3 %vm252_vm1, %v1085_v63  ;;  %v1582_v13 = vsel %vm1492_vm3, %v1581_v20, %v1580_v45  ;;  %v1590_v52 = vsel %vm1483_vm12, %v1589_v55, %v1588_v16  ;;  %v1595_v44 = vrot.slane %v1070_v39, 2 }
 0x2e2   :  { %v1055_v30 = vmul.f32 %v2372_v0, %v1054_v34  ;;  %v1584_v14 = vsel %vm1495_vm4, %v1583_v12, %v1582_v13  ;;  %v1592_v35 = vsel %vm1486_vm2, %v1591_v41, %v1590_v52  ;;  %v1597_v21 = vrot.slane %v1085_v63, 1  ;;  %v1541_v0 = vld [vmem:[#allocation8 + $0x18] sm:$0xff]  ;;  %v1731_v34 = vld [vmem:[%s2917_s7] ss:$0 sm:$0xff] }
 0x2e3   :  { %1601 = vst.msk [vmem:[#allocation11] sm:$0xff] %vm252_vm1, %v1584_v14  ;;  %1554 = vmatpush.msra.mxu1 %v1541_v0 }
 0x2e4   :  { %v1593_v60 = vrot.slane %v1055_v30, 3 }
 0x2e5   :  { %1707 = vmatmul.msk.f32.vlgmr.msrb.gmra.mxu1 %vm252_vm1, %v1055_v30 }
 0x2e6   :  { %v1594_v9 = vsel %vm1489_vm14, %v1593_v60, %v1592_v35  ;;  %1555 = vmatpush.msra.mxu1 %v1540_v59 }
 0x2e7   :  { %v1596_v25 = vsel %vm1492_vm3, %v1595_v44, %v1594_v9 }
 0x2e8   :  { %v1598_v20 = vsel %vm1495_vm4, %v1597_v21, %v1596_v25  ;;  %1556 = vmatpush.msra.mxu1 %v1539_v8 }
 0x2e9   :  { %1602 = vst.msk [vmem:[#allocation11 + $0x8] sm:$0xff] %vm252_vm1, %v1598_v20 }
 0x2ea   :  { %1557 = vmatpush.msra.mxu1 %v1538_v17  ;;  %1628 = dma.vmem_to_hbm [thread:$0]  %s1621_s12, 256, %s1623_s15, [#allocation12], %s1959_s21, %s1959_s21, %s1960_s22  }
 0x2ed   :  { %1712 = vmatmul.msk.f32.vlgmr.msra.gmra.mxu1 %vm141_vm0, %v1802_v36 }
 0x2f5   :  { %1713 = vmatmul.msk.f32.gmra.mxu1 %vm141_vm0, %v1803_v61 }
 0x325   :  { %v1106_v10 = vpop.f32.mrf.mxu0 }
 0x32d   :  { %v1129_v27 = vpop.f32.mrf.mxu1 }
 0x32e   :  { %v1476_v24 = vrot.slane %v1129_v27, 7 }
 0x330   :  { %v1478_v31 = vsel %vm1477_vm10, %v1476_v24, %v1106_v10 }
 0x33f   :  { %v1152_v15 = vpop.f32.mrf.mxu2  ;;  %v1175_v29 = vpop.f32.mrf.mxu3 }
 0x340   :  { %v1479_v43 = vrot.slane %v1152_v15, 6  ;;  %v1482_v32 = vrot.slane %v1175_v29, 5 }
 0x342   :  { %v1481_v7 = vsel %vm1480_vm11, %v1479_v43, %v1478_v31 }
 0x343   :  { %v1484_v47 = vsel %vm1483_vm12, %v1482_v32, %v1481_v7 }
 0x346   :  { %v1198_v57 = vpop.f32.mrf.mxu0 }
 0x347   :  { %v1485_v46 = vrot.slane %v1198_v57, 4 }
 0x349   :  { %v1487_v5 = vsel %vm1486_vm2, %v1485_v46, %v1484_v47 }
 0x34c   :  { %v1244_v40 = vpop.f32.mrf.mxu2 }
 0x34d   :  { %v1491_v37 = vrot.slane %v1244_v40, 2 }
 0x350   :  { %v1267_v49 = vpop.f32.mrf.mxu3 }
 0x351   :  { %v1494_v11 = vrot.slane %v1267_v49, 1 }
 0x352   :  { %v1221_v38 = vpop.f32.mrf.mxu1 }
 0x353   :  { %v1488_v18 = vrot.slane %v1221_v38, 3 }
 0x355   :  { %v1490_v42 = vsel %vm1489_vm14, %v1488_v18, %v1487_v5 }
 0x356   :  { %v1290_v39 = vpop.f32.mrf.mxu0  ;;  %v1493_v51 = vsel %vm1492_vm3, %v1491_v37, %v1490_v42 }
 0x357   :  { %v1496_v50 = vsel %vm1495_vm4, %v1494_v11, %v1493_v51 }
 0x358   :  { %1710 = vmatmul.msk.f32.vlgmr.msra.gmra.mxu0 %vm252_vm1, %v1496_v50 }
 0x359   :  { %v1336_v3 = vpop.f32.mrf.mxu2 }
 0x35a   :  { %v1313_v53 = vpop.f32.mrf.mxu1  ;;  %v1499_v58 = vrot.slane %v1336_v3, 6 }
 0x35b   :  { %v1497_v56 = vrot.slane %v1313_v53, 7 }
 0x35c   :  { %v1359_v6 = vpop.f32.mrf.mxu3 }
 0x35d   :  { %v1498_v22 = vsel %vm1477_vm10, %v1497_v56, %v1290_v39  ;;  %v1501_v1 = vrot.slane %v1359_v6, 5 }
 0x35e   :  { %v1382_v23 = vpop.f32.mrf.mxu0  ;;  %v1500_v55 = vsel %vm1480_vm11, %v1499_v58, %v1498_v22 }
 0x35f   :  { %v1503_v48 = vrot.slane %v1382_v23, 4  ;;  %v1502_v28 = vsel %vm1483_vm12, %v1501_v1, %v1500_v55 }
 0x361   :  { %v1428_v2 = vpop.f32.mrf.mxu2  ;;  %v1504_v33 = vsel %vm1486_vm2, %v1503_v48, %v1502_v28 }
 0x362   :  { %v1405_v54 = vpop.f32.mrf.mxu1  ;;  %v1507_v63 = vrot.slane %v1428_v2, 2 }
 0x363   :  { %v1505_v16 = vrot.slane %v1405_v54, 3 }
 0x364   :  { %v1451_v41 = vpop.f32.mrf.mxu3 }
 0x365   :  { %v1509_v26 = vrot.slane %v1451_v41, 1  ;;  %v1506_v19 = vsel %vm1489_vm14, %v1505_v16, %v1504_v33 }
 0x366   :  { %v1508_v45 = vsel %vm1492_vm3, %v1507_v63, %v1506_v19 }
 0x367   :  { %v1510_v12 = vsel %vm1495_vm4, %v1509_v26, %v1508_v45 }
 0x368   :  { %1711 = vmatmul.msk.f32.gmra.mxu0 %vm252_vm1, %v1510_v12 }
 0x36a   :  { %v1559_v30 = vpop.f32.mrf.mxu1 }
 0x372   :  { %v1562_v44 = vpop.f32.mrf.mxu1 }
 0x3d5   :  { %v1532_v13 = vpop.f32.mrf.mxu0 }
 0x3d6   :  { %v1533_v52 = vadd.f32 %v1731_v34, %v1532_v13 }
 0x3d8   :  { %v1565_v14 = vadd.f32 %v1559_v30, %v1533_v52 }
 0x3da   :  { %1796 = vtanh.f32 %v1565_v14 }
 0x3e0   :  { %v1797_v35 = vpop.eup %1796 }
 0x3e1   :  { %1569 = vst.msk [vmem:[#allocation10] sm:$0xff] %vm141_vm0, %v1797_v35 }
 0x3e5   :  { %v1535_v60 = vpop.f32.mrf.mxu0 }
 0x3e6   :  { %v1536_v21 = vadd.f32 %v1731_v34, %v1535_v60 }
 0x3e8   :  { %v1566_v9 = vadd.f32 %v1562_v44, %v1536_v21 }
 0x3ea   :  { %1798 = vtanh.f32 %v1566_v9 }
 0x3f0   :  { %v1799_v25 = vpop.eup %1798 }
 0x3f1   :  { %1570 = vst.msk [vmem:[#allocation10 + $0x8] sm:$0xff] %vm141_vm0, %v1799_v25 }
 0x3f2   :  { %1615 = dma.vmem_to_hbm [thread:$0]  %s1608_s18, 256, %s1610_s23, [#allocation4], %s1959_s21, %s1959_s21, %s1960_s22  }
 0x3f3   :  { %1954 = dma.done.wait [#allocation4], 256  }
 0x3f4   :  { %1955 = vsyncadd [#allocation4], 4294967040 }
 0x3f5   :  { %1956 = dma.done.wait [#allocation12], 256  }
 0x3f6   :  { %1957 = vsyncadd [#allocation12], 4294967040 }
 0x3f7   :  { %1637 = vsyncpa [#allocation3], 1 }
 0x3f8   :  { %1638 = vsyncpa [#allocation6], 1 }
 0x3f9   :  { %1639 = vsyncpa [#allocation9], 1 }
 0x3fa   :  { %1640 = vsyncpa [#allocation4], 1 }
 0x3fb   :  { %1641 = vsyncpa [#allocation12], 1 }

</bundles_post_ra>
